<compile_context>
chip_gen: v7x
topology: tpu7x:2x2x1
jax: 0.10.0
libtpu: 0.0.40
codegen_flags: <defaults>
</compile_context>

<pallas_src>
from functools import partial

import jax
import jax.numpy as jnp
import numpy as np
from jax import lax
from jax.experimental import pallas as pl
from jax.experimental.pallas import tpu as pltpu


def _round_up(x, m):
    return ((x + m - 1) // m) * m


def _pick_block_b(B):
    if B <= 8:
        return B
    # Aim for >=2 batch blocks (v7x has 2 TensorCores on the "parallel" axis),
    # cap at 256 rows so the MXU M dim is well fed but VMEM stays bounded.
    half = _round_up((B + 1) // 2, 8)
    return min(256, max(8, half), _round_up(B, 8))


# -----------------------------------------------------------------------------
# Pallas kernel: one grid step = one decode time step for one batch block.
# -----------------------------------------------------------------------------
def caption_decoder_kernel(
    tf_ref,       # SMEM (T-1,) i32 (scalar prefetch): 1 -> teacher forcing
    feat_ref,     # VMEM (bB, H) f32   : encoder features (== h0)
    cap_emb_ref,  # VMEM (1, bB, E)    : embed(captions[:, t]) for this step
    embed_ref,    # VMEM (Vp, E)       : embedding table (vocab padded)
    w_ih_e_ref,   # VMEM (E, 4H)       : LSTM input weights, embedding part
    w_ih_h_ref,   # VMEM (H, 4H)       : LSTM input weights, context part
    w_hh_ref,     # VMEM (H, 4H)       : LSTM hidden weights
    b_lstm_ref,   # VMEM (1, 4H) f32   : b_ih + b_hh
    w_fc_ref,     # VMEM (H, Vp)       : output projection (vocab padded)
    b_fc_ref,     # VMEM (1, Vp) f32   : bias, padded lanes = -1e30
    out_ref,      # VMEM (bB, Vp) f32  : this step's logits
    emb_scr,      # scratch VMEM (bB, E): current-step input embedding
    h_scr,        # scratch VMEM (bB, H) f32
    c_scr,        # scratch VMEM (bB, H) f32
    ctx_scr,      # scratch VMEM (bB, 4H) f32: hoisted context-gate term
):
    t = pl.program_id(1)
    n_steps = pl.num_programs(1)
    H = h_scr.shape[-1]

    # t == 0: fresh batch block. h0 = features, c0 = 0. softmax over a size-1
    # dim == 1.0 exactly, so context == features on every step; hoist its
    # loop-invariant gate contribution (plus both LSTM biases) into ctx_scr.
    @pl.when(t == 0)
    def _():
        feats = feat_ref[...]
        h_scr[...] = feats
        c_scr[...] = jnp.zeros_like(feats)
        ctx_scr[...] = (
            jnp.dot(feats.astype(w_ih_h_ref.dtype), w_ih_h_ref[...],
                    preferred_element_type=jnp.float32)
            + b_lstm_ref[...])

    # Input embedding for this step: the ground-truth caption word if t == 0 or
    # the previous step was teacher-forced, otherwise the greedy embedding that
    # the previous step wrote into emb_scr.
    tf_prev = tf_ref[jnp.maximum(t - 1, 0)]

    @pl.when(jnp.logical_or(t == 0, tf_prev == 1))
    def _():
        emb_scr[...] = cap_emb_ref[0]

    emb = emb_scr[...]
    h = h_scr[...]
    c = c_scr[...]

    # LSTM cell, PyTorch gate order (i, f, g, o); f32 accumulation/elementwise.
    gates = (
        jnp.dot(emb, w_ih_e_ref[...], preferred_element_type=jnp.float32)
        + jnp.dot(h.astype(w_hh_ref.dtype), w_hh_ref[...],
                  preferred_element_type=jnp.float32)
        + ctx_scr[...])
    i_g = jax.nn.sigmoid(gates[:, 0 * H:1 * H])
    f_g = jax.nn.sigmoid(gates[:, 1 * H:2 * H])
    g_g = jnp.tanh(gates[:, 2 * H:3 * H])
    o_g = jax.nn.sigmoid(gates[:, 3 * H:4 * H])
    c = f_g * c + i_g * g_g
    h = o_g * jnp.tanh(c)
    h_scr[...] = h
    c_scr[...] = c

    logits = (jnp.dot(h.astype(w_fc_ref.dtype), w_fc_ref[...],
                      preferred_element_type=jnp.float32)
              + b_fc_ref[...])
    out_ref[...] = logits                       # lane-dense (Vp % 128 == 0)

    # Greedy next-word embedding: only when the next step exists and is NOT
    # teacher-forced. First-occurrence argmax tie-break like torch; padded
    # logits lanes carry -1e30 so they can never win.
    @pl.when(jnp.logical_and(t + 1 < n_steps, tf_ref[t] == 0))
    def _():
        Vp = logits.shape[1]
        iota = lax.broadcasted_iota(jnp.int32, logits.shape, 1)
        mx = jnp.max(logits, axis=1, keepdims=True)
        first_max = jnp.min(jnp.where(logits == mx, iota, Vp),
                            axis=1, keepdims=True)
        onehot = (iota == first_max).astype(embed_ref.dtype)
        # TODO(synk): for production vocab sizes replace this one-hot matmul
        # (streams the whole (Vp, E) table through the MXU) with an index/DMA
        # row gather of the bB selected embedding rows.
        emb_scr[...] = jnp.dot(onehot, embed_ref[...],
                               preferred_element_type=jnp.float32
                               ).astype(emb_scr.dtype)


# -----------------------------------------------------------------------------
# Wrapper
# -----------------------------------------------------------------------------
@partial(jax.jit, static_argnames=("compute_dtype",))
def caption_decoder_forward(features, captions, tf_flags, params,
                            compute_dtype=jnp.float32):
    f32 = jnp.float32
    B, H = features.shape
    T = captions.shape[1]
    V, E = params["embed"].shape
    H4 = 4 * H
    Vp = _round_up(V, 128)
    n_steps = T - 1
    cdt = np.dtype(compute_dtype)

    # Weight prep (XLA side): split W_ih (kills the per-step concat), fold both
    # biases, pre-transpose, pad the vocab axis to a lane-dense multiple of 128
    # (padded logits lanes get -1e30 so argmax never selects them). Large
    # matmul operands go to compute_dtype (bf16 halves VMEM residency and uses
    # the bf16-native MXU path); biases / recurrent state stay f32.
    embed_c = params["embed"].astype(cdt)
    cap_emb_tm = jnp.transpose(embed_c[captions], (1, 0, 2))        # (T, B, E)
    embed_p = jnp.zeros((Vp, E), cdt).at[:V, :].set(embed_c)
    w_ih_e = params["w_ih"][:, :E].T.astype(cdt)                    # (E, 4H)
    w_ih_h = params["w_ih"][:, E:].T.astype(cdt)                    # (H, 4H)
    w_hh_t = params["w_hh"].T.astype(cdt)                           # (H, 4H)
    b_lstm = (params["b_ih"] + params["b_hh"]).reshape(1, H4).astype(f32)
    w_fc_p = jnp.zeros((H, Vp), cdt).at[:, :V].set(params["w_fc"].T.astype(cdt))
    b_fc_p = jnp.full((1, Vp), -1e30, f32).at[0, :V].set(
        params["b_fc"].astype(f32))
    # NOTE: the attention Linear (w_att, b_att) is provably a no-op
    # (softmax over a size-1 dim == 1), so it never reaches the kernel.

    block_b = _pick_block_b(B)
    nb = pl.cdiv(B, block_b)

    # VMEM budget: weights single-buffered (unblocked VMEM operands), pipelined
    # blocks double-buffered; cap by the chip's actual VMEM capacity.
    wbytes = ((Vp * E + E * H4 + 2 * H * H4 + H * Vp) * cdt.itemsize
              + (H4 + Vp) * 4)
    pbytes = 2 * (block_b * H * 4 + block_b * E * cdt.itemsize
                  + block_b * Vp * 4)
    sbytes = block_b * E * cdt.itemsize + block_b * (2 * H + H4) * 4
    try:
        vmem_cap = getattr(pltpu.get_tpu_info(), "vmem_capacity_bytes",
                           64 * 1024 * 1024)
    except Exception:
        vmem_cap = 64 * 1024 * 1024
    vmem_limit = int(min(int(0.9 * vmem_cap),
                         max(wbytes + pbytes + sbytes + (2 << 20), 16 << 20)))

    grid_spec = pltpu.PrefetchScalarGridSpec(
        num_scalar_prefetch=1,
        grid=(nb, n_steps),
        in_specs=[
            pl.BlockSpec((block_b, H), lambda b, t, tf: (b, 0)),        # feats
            pl.BlockSpec((1, block_b, E), lambda b, t, tf: (t, b, 0)),  # cap_emb
            pl.BlockSpec(memory_space=pltpu.MemorySpace.VMEM),          # embed
            pl.BlockSpec(memory_space=pltpu.MemorySpace.VMEM),          # w_ih_e
            pl.BlockSpec(memory_space=pltpu.MemorySpace.VMEM),          # w_ih_h
            pl.BlockSpec(memory_space=pltpu.MemorySpace.VMEM),          # w_hh
            pl.BlockSpec(memory_space=pltpu.MemorySpace.VMEM),          # b_lstm
            pl.BlockSpec(memory_space=pltpu.MemorySpace.VMEM),          # w_fc
            pl.BlockSpec(memory_space=pltpu.MemorySpace.VMEM),          # b_fc
        ],
        # Output laid out as (B, (T-1)*Vp): each grid step writes one full,
        # lane-dense (block_b, Vp) slab; the wrapper reshape to (B, T-1, Vp)
        # is metadata-only (no transpose / extra HBM pass).
        out_specs=pl.BlockSpec((block_b, Vp), lambda b, t, tf: (b, t)),
        scratch_shapes=[
            pltpu.VMEM((block_b, E), cdt),     # current input embedding
            pltpu.VMEM((block_b, H), f32),     # h
            pltpu.VMEM((block_b, H), f32),     # c
            pltpu.VMEM((block_b, H4), f32),    # hoisted context-gate term
        ],
    )

    out_flat = pl.pallas_call(
        caption_decoder_kernel,
        out_shape=jax.ShapeDtypeStruct((B, n_steps * Vp), f32),
        grid_spec=grid_spec,
        compiler_params=pltpu.CompilerParams(
            dimension_semantics=("parallel", "arbitrary"),
            vmem_limit_bytes=vmem_limit,
        ),
    )(tf_flags.astype(jnp.int32), features.astype(f32), cap_emb_tm, embed_p,
      w_ih_e, w_ih_h, w_hh_t, b_lstm, w_fc_p, b_fc_p)

    # Matches torch.stack(hiddens, dim=1): (B, T-1, V). The slice is a no-op
    # when V is already a multiple of 128.
    # TODO(synk): for very large vocabularies, stream w_fc / logits in vocab
    # chunks with a running (max, argmax) carry instead of keeping the full
    # (H, Vp) projection resident in VMEM (needed for v7x's 64 MiB VMEM).
    out = out_flat.reshape(B, n_steps, Vp)
    return out if Vp == V else out[:, :, :V]


# -----------------------------------------------------------------------------
# Pure-JAX reference (mirrors the PyTorch forward exactly)
# -----------------------------------------------------------------------------
def caption_decoder_reference(features, captions, tf_flags, params):
    B, H = features.shape
    T = captions.shape[1]
    embed = params["embed"]
    cap_emb = embed[captions]
    h = features
    c = jnp.zeros_like(h)
    cur_emb = cap_emb[:, 0]
    outs = []
    for t in range(T - 1):
        score = h @ params["w_att"].T + params["b_att"]
        att = jax.nn.softmax(score, axis=1)          # size-1 dim -> exactly 1.0
        context = att * features
        x = jnp.concatenate([cur_emb, context], axis=1)
        gates = (x @ params["w_ih"].T + params["b_ih"]
                 + h @ params["w_hh"].T + params["b_hh"])
        i_g = jax.nn.sigmoid(gates[:, 0 * H:1 * H])
        f_g = jax.nn.sigmoid(gates[:, 1 * H:2 * H])
        g_g = jnp.tanh(gates[:, 2 * H:3 * H])
        o_g = jax.nn.sigmoid(gates[:, 3 * H:4 * H])
        c = f_g * c + i_g * g_g
        h = o_g * jnp.tanh(c)
        logits = h @ params["w_fc"].T + params["b_fc"]
        outs.append(logits)
        pred = jnp.argmax(logits, axis=1)
        nxt = jnp.where(tf_flags[t] == 1, captions[:, t + 1], pred)
        cur_emb = embed[nxt]
    return jnp.stack(outs, axis=1)


# -----------------------------------------------------------------------------
# Main
# -----------------------------------------------------------------------------
if __name__ == "__main__":
    B, T = 2, 8               # batch, caption length
    E, H, V = 32, 32, 64      # embed_size, hidden_size, vocab_size

    key = jax.random.PRNGKey(0)
    keys = jax.random.split(key, 12)

    params = {
        "embed": 0.1 * jax.random.normal(keys[0], (V, E), jnp.float32),
        "w_att": 0.1 * jax.random.normal(keys[1], (1, H), jnp.float32),
        "b_att": 0.1 * jax.random.normal(keys[2], (1,), jnp.float32),
        "w_ih": 0.1 * jax.random.normal(keys[3], (4 * H, E + H), jnp.float32),
        "w_hh": 0.1 * jax.random.normal(keys[4], (4 * H, H), jnp.float32),
        "b_ih": 0.1 * jax.random.normal(keys[5], (4 * H,), jnp.float32),
        "b_hh": 0.1 * jax.random.normal(keys[6], (4 * H,), jnp.float32),
        "w_fc": 0.1 * jax.random.normal(keys[7], (V, H), jnp.float32),
        "b_fc": 0.1 * jax.random.normal(keys[8], (V,), jnp.float32),
    }

    features = jax.random.normal(keys[9], (B, H), jnp.float32)
    captions = jax.random.randint(keys[10], (B, T), 0, V, jnp.int32)
    # Deterministic stand-in for the per-step torch.rand(1) < ratio coin flips.
    tf_flags = (jax.random.uniform(keys[11], (T - 1,)) < 0.5).astype(jnp.int32)

    # f32 path: bitwise-comparable (up to tolerance) with the reference.
    out = caption_decoder_forward(features, captions, tf_flags, params)
    out = jax.block_until_ready(out)

    ref = caption_decoder_reference(features, captions, tf_flags, params)
    np.testing.assert_allclose(np.asarray(out), np.asarray(ref),
                               rtol=2e-3, atol=2e-3)
    assert out.shape == (B, T - 1, V)

    # bf16 weight path (production configuration): run and sanity-check only
    # (greedy argmax decisions may legitimately differ from the f32 reference).
    out_bf16 = caption_decoder_forward(features, captions, tf_flags, params,
                                       compute_dtype=jnp.bfloat16)
    out_bf16 = jax.block_until_ready(out_bf16)
    assert out_bf16.shape == (B, T - 1, V)
    assert bool(jnp.all(jnp.isfinite(out_bf16)))

    print("KERNEL_OK")
</pallas_src>

<mosaic_0001>
module attributes {stable_mosaic.version = 11 : i64} {
  func.func @caption_decoder_kernel(%arg0: i32, %arg1: i32, %arg2: memref<7xi32, #tpu.memory_space<smem>>, %arg3: memref<2x32xf32, #tpu.memory_space<vmem>>, %arg4: memref<1x2x32xf32, #tpu.memory_space<vmem>>, %arg5: memref<128x32xf32, #tpu.memory_space<vmem>>, %arg6: memref<32x128xf32, #tpu.memory_space<vmem>>, %arg7: memref<32x128xf32, #tpu.memory_space<vmem>>, %arg8: memref<32x128xf32, #tpu.memory_space<vmem>>, %arg9: memref<1x128xf32, #tpu.memory_space<vmem>>, %arg10: memref<32x128xf32, #tpu.memory_space<vmem>>, %arg11: memref<1x128xf32, #tpu.memory_space<vmem>>, %arg12: memref<2x128xf32, #tpu.memory_space<vmem>>, %arg13: memref<2x32xf32, #tpu.memory_space<vmem>>, %arg14: memref<2x32xf32, #tpu.memory_space<vmem>>, %arg15: memref<2x32xf32, #tpu.memory_space<vmem>>, %arg16: memref<2x128xf32, #tpu.memory_space<vmem>>) attributes {dimension_semantics = [#tpu.dimension_semantics<parallel>, #tpu.dimension_semantics<arbitrary>], iteration_bounds = array<i64: 1, 7>, scalar_prefetch = 1 : i64, scratch_operands = 4 : i64, tpu.core_type = #tpu.core_type<tc>, window_params = [{transform_indices = @transform_0, window_bounds = array<i64: 2, 32>}, {transform_indices = @transform_1, window_bounds = array<i64: 1, 2, 32>}, {pipeline_mode = #tpu.pipeline_mode<synchronous>, transform_indices = @transform_2, window_bounds = array<i64: 128, 32>}, {pipeline_mode = #tpu.pipeline_mode<synchronous>, transform_indices = @transform_3, window_bounds = array<i64: 32, 128>}, {pipeline_mode = #tpu.pipeline_mode<synchronous>, transform_indices = @transform_4, window_bounds = array<i64: 32, 128>}, {pipeline_mode = #tpu.pipeline_mode<synchronous>, transform_indices = @transform_5, window_bounds = array<i64: 32, 128>}, {pipeline_mode = #tpu.pipeline_mode<synchronous>, transform_indices = @transform_6, window_bounds = array<i64: 1, 128>}, {pipeline_mode = #tpu.pipeline_mode<synchronous>, transform_indices = @transform_7, window_bounds = array<i64: 32, 128>}, {pipeline_mode = #tpu.pipeline_mode<synchronous>, transform_indices = @transform_8, window_bounds = array<i64: 1, 128>}, {transform_indices = @transform_9, window_bounds = array<i64: 2, 128>}]} {
    %c0_i32 = arith.constant 0 : i32
    %0 = arith.cmpi eq, %arg1, %c0_i32 : i32
    %1 = arith.extui %0 : i1 to i32
    %c0_i32_0 = arith.constant 0 : i32
    %2 = arith.cmpi ne, %1, %c0_i32_0 : i32
    scf.if %2 {
      %c0_34 = arith.constant 0 : index
      %c0_35 = arith.constant 0 : index
      %63 = vector.load %arg3[%c0_34, %c0_35] : memref<2x32xf32, #tpu.memory_space<vmem>>, vector<2x32xf32>
      %c0_36 = arith.constant 0 : index
      %c0_37 = arith.constant 0 : index
      %64 = vector.load %arg14[%c0_36, %c0_37] : memref<2x32xf32, #tpu.memory_space<vmem>>, vector<2x32xf32>
      tpu.vector_store %arg14[%c0_36, %c0_37], %63 {strides = array<i32>} : memref<2x32xf32, #tpu.memory_space<vmem>>, vector<2x32xf32>,
      %cst_38 = arith.constant 0.000000e+00 : f32
      %65 = vector.broadcast %cst_38 : f32 to vector<2x32xf32>
      %c0_39 = arith.constant 0 : index
      %c0_40 = arith.constant 0 : index
      %66 = vector.load %arg15[%c0_39, %c0_40] : memref<2x32xf32, #tpu.memory_space<vmem>>, vector<2x32xf32>
      tpu.vector_store %arg15[%c0_39, %c0_40], %65 {strides = array<i32>} : memref<2x32xf32, #tpu.memory_space<vmem>>, vector<2x32xf32>,
      %c0_41 = arith.constant 0 : index
      %c0_42 = arith.constant 0 : index
      %67 = vector.load %arg7[%c0_41, %c0_42] : memref<32x128xf32, #tpu.memory_space<vmem>>, vector<32x128xf32>
      %cst_43 = arith.constant dense<0.000000e+00> : vector<2x128xf32>
      %68 = tpu.matmul %63, %67, %cst_43 {dimension_numbers = #tpu.dot_dimension_numbers<[1], [0], [0], [1], [0, 0, 1, 1], [], []>} : vector<2x32xf32>, vector<32x128xf32>, vector<2x128xf32> -> vector<2x128xf32>
      %c0_44 = arith.constant 0 : index
      %c0_45 = arith.constant 0 : index
      %69 = vector.load %arg9[%c0_44, %c0_45] : memref<1x128xf32, #tpu.memory_space<vmem>>, vector<1x128xf32>
      %70 = vector.broadcast %69 : vector<1x128xf32> to vector<2x128xf32>
      %71 = arith.addf %68, %70 : vector<2x128xf32>
      %c0_46 = arith.constant 0 : index
      %c0_47 = arith.constant 0 : index
      %72 = vector.load %arg16[%c0_46, %c0_47] : memref<2x128xf32, #tpu.memory_space<vmem>>, vector<2x128xf32>
      tpu.vector_store %arg16[%c0_46, %c0_47], %71 {strides = array<i32>} : memref<2x128xf32, #tpu.memory_space<vmem>>, vector<2x128xf32>,
    } else {
    }
    %c1_i32 = arith.constant 1 : i32
    %3 = arith.subi %arg1, %c1_i32 : i32
    %c0_i32_1 = arith.constant 0 : i32
    %4 = arith.maxsi %3, %c0_i32_1 : i32
    %5 = arith.index_cast %4 : i32 to index
    %6 = memref.load %arg2[%5] : memref<7xi32, #tpu.memory_space<smem>>
    %c0_i32_2 = arith.constant 0 : i32
    %7 = arith.cmpi eq, %arg1, %c0_i32_2 : i32
    %c1_i32_3 = arith.constant 1 : i32
    %8 = arith.cmpi eq, %6, %c1_i32_3 : i32
    %9 = arith.ori %7, %8 : i1
    %10 = arith.extui %9 : i1 to i32
    %c0_i32_4 = arith.constant 0 : i32
    %11 = arith.cmpi ne, %10, %c0_i32_4 : i32
    scf.if %11 {
      %c0_34 = arith.constant 0 : index
      %c0_35 = arith.constant 0 : index
      %c0_36 = arith.constant 0 : index
      %63 = vector.load %arg4[%c0_34, %c0_35, %c0_36] : memref<1x2x32xf32, #tpu.memory_space<vmem>>, vector<1x2x32xf32>
      %64 = vector.shape_cast %63 : vector<1x2x32xf32> to vector<2x32xf32>
      %c0_37 = arith.constant 0 : index
      %c0_38 = arith.constant 0 : index
      %65 = vector.load %arg13[%c0_37, %c0_38] : memref<2x32xf32, #tpu.memory_space<vmem>>, vector<2x32xf32>
      tpu.vector_store %arg13[%c0_37, %c0_38], %64 {strides = array<i32>} : memref<2x32xf32, #tpu.memory_space<vmem>>, vector<2x32xf32>,
    } else {
    }
    %c0 = arith.constant 0 : index
    %c0_5 = arith.constant 0 : index
    %12 = vector.load %arg13[%c0, %c0_5] : memref<2x32xf32, #tpu.memory_space<vmem>>, vector<2x32xf32>
    %c0_6 = arith.constant 0 : index
    %c0_7 = arith.constant 0 : index
    %13 = vector.load %arg14[%c0_6, %c0_7] : memref<2x32xf32, #tpu.memory_space<vmem>>, vector<2x32xf32>
    %c0_8 = arith.constant 0 : index
    %c0_9 = arith.constant 0 : index
    %14 = vector.load %arg15[%c0_8, %c0_9] : memref<2x32xf32, #tpu.memory_space<vmem>>, vector<2x32xf32>
    %c0_10 = arith.constant 0 : index
    %c0_11 = arith.constant 0 : index
    %15 = vector.load %arg6[%c0_10, %c0_11] : memref<32x128xf32, #tpu.memory_space<vmem>>, vector<32x128xf32>
    %cst = arith.constant dense<0.000000e+00> : vector<2x128xf32>
    %16 = tpu.matmul %12, %15, %cst {dimension_numbers = #tpu.dot_dimension_numbers<[1], [0], [0], [1], [0, 0, 1, 1], [], []>} : vector<2x32xf32>, vector<32x128xf32>, vector<2x128xf32> -> vector<2x128xf32>
    %c0_12 = arith.constant 0 : index
    %c0_13 = arith.constant 0 : index
    %17 = vector.load %arg8[%c0_12, %c0_13] : memref<32x128xf32, #tpu.memory_space<vmem>>, vector<32x128xf32>
    %cst_14 = arith.constant dense<0.000000e+00> : vector<2x128xf32>
    %18 = tpu.matmul %13, %17, %cst_14 {dimension_numbers = #tpu.dot_dimension_numbers<[1], [0], [0], [1], [0, 0, 1, 1], [], []>} : vector<2x32xf32>, vector<32x128xf32>, vector<2x128xf32> -> vector<2x128xf32>
    %19 = arith.addf %16, %18 : vector<2x128xf32>
    %c0_15 = arith.constant 0 : index
    %c0_16 = arith.constant 0 : index
    %20 = vector.load %arg16[%c0_15, %c0_16] : memref<2x128xf32, #tpu.memory_space<vmem>>, vector<2x128xf32>
    %21 = arith.addf %19, %20 : vector<2x128xf32>
    %22 = vector.extract_strided_slice %21 {offsets = [0, 0], sizes = [2, 32], strides = [1, 1]} : vector<2x128xf32> to vector<2x32xf32>
    %23 = arith.negf %22 : vector<2x32xf32>
    %24 = math.exp %23 : vector<2x32xf32>
    %cst_17 = arith.constant 1.000000e+00 : f32
    %25 = vector.broadcast %cst_17 : f32 to vector<2x32xf32>
    %26 = arith.addf %25, %24 : vector<2x32xf32>
    %27 = arith.divf %25, %26 : vector<2x32xf32>
    %28 = vector.extract_strided_slice %21 {offsets = [0, 32], sizes = [2, 32], strides = [1, 1]} : vector<2x128xf32> to vector<2x32xf32>
    %29 = arith.negf %28 : vector<2x32xf32>
    %30 = math.exp %29 : vector<2x32xf32>
    %cst_18 = arith.constant 1.000000e+00 : f32
    %31 = vector.broadcast %cst_18 : f32 to vector<2x32xf32>
    %32 = arith.addf %31, %30 : vector<2x32xf32>
    %33 = arith.divf %31, %32 : vector<2x32xf32>
    %34 = vector.extract_strided_slice %21 {offsets = [0, 64], sizes = [2, 32], strides = [1, 1]} : vector<2x128xf32> to vector<2x32xf32>
    %35 = math.tanh %34 : vector<2x32xf32>
    %36 = vector.extract_strided_slice %21 {offsets = [0, 96], sizes = [2, 32], strides = [1, 1]} : vector<2x128xf32> to vector<2x32xf32>
    %37 = arith.negf %36 : vector<2x32xf32>
    %38 = math.exp %37 : vector<2x32xf32>
    %cst_19 = arith.constant 1.000000e+00 : f32
    %39 = vector.broadcast %cst_19 : f32 to vector<2x32xf32>
    %40 = arith.addf %39, %38 : vector<2x32xf32>
    %41 = arith.divf %39, %40 : vector<2x32xf32>
    %42 = arith.mulf %33, %14 : vector<2x32xf32>
    %43 = arith.mulf %27, %35 : vector<2x32xf32>
    %44 = arith.addf %42, %43 : vector<2x32xf32>
    %45 = math.tanh %44 : vector<2x32xf32>
    %46 = arith.mulf %41, %45 : vector<2x32xf32>
    %c0_20 = arith.constant 0 : index
    %c0_21 = arith.constant 0 : index
    %47 = vector.load %arg14[%c0_20, %c0_21] : memref<2x32xf32, #tpu.memory_space<vmem>>, vector<2x32xf32>
    tpu.vector_store %arg14[%c0_20, %c0_21], %46 {strides = array<i32>} : memref<2x32xf32, #tpu.memory_space<vmem>>, vector<2x32xf32>,
    %c0_22 = arith.constant 0 : index
    %c0_23 = arith.constant 0 : index
    %48 = vector.load %arg15[%c0_22, %c0_23] : memref<2x32xf32, #tpu.memory_space<vmem>>, vector<2x32xf32>
    tpu.vector_store %arg15[%c0_22, %c0_23], %44 {strides = array<i32>} : memref<2x32xf32, #tpu.memory_space<vmem>>, vector<2x32xf32>,
    %c0_24 = arith.constant 0 : index
    %c0_25 = arith.constant 0 : index
    %49 = vector.load %arg10[%c0_24, %c0_25] : memref<32x128xf32, #tpu.memory_space<vmem>>, vector<32x128xf32>
    %cst_26 = arith.constant dense<0.000000e+00> : vector<2x128xf32>
    %50 = tpu.matmul %46, %49, %cst_26 {dimension_numbers = #tpu.dot_dimension_numbers<[1], [0], [0], [1], [0, 0, 1, 1], [], []>} : vector<2x32xf32>, vector<32x128xf32>, vector<2x128xf32> -> vector<2x128xf32>
    %c0_27 = arith.constant 0 : index
    %c0_28 = arith.constant 0 : index
    %51 = vector.load %arg11[%c0_27, %c0_28] : memref<1x128xf32, #tpu.memory_space<vmem>>, vector<1x128xf32>
    %52 = vector.broadcast %51 : vector<1x128xf32> to vector<2x128xf32>
    %53 = arith.addf %50, %52 : vector<2x128xf32>
    %c0_29 = arith.constant 0 : index
    %c0_30 = arith.constant 0 : index
    %54 = vector.load %arg12[%c0_29, %c0_30] : memref<2x128xf32, #tpu.memory_space<vmem>>, vector<2x128xf32>
    tpu.vector_store %arg12[%c0_29, %c0_30], %53 {strides = array<i32>} : memref<2x128xf32, #tpu.memory_space<vmem>>, vector<2x128xf32>,
    %c1_i32_31 = arith.constant 1 : i32
    %55 = arith.addi %arg1, %c1_i32_31 : i32
    %c7_i32 = arith.constant 7 : i32
    %56 = arith.cmpi slt, %55, %c7_i32 : i32
    %57 = arith.index_cast %arg1 : i32 to index
    %58 = memref.load %arg2[%57] : memref<7xi32, #tpu.memory_space<smem>>
    %c0_i32_32 = arith.constant 0 : i32
    %59 = arith.cmpi eq, %58, %c0_i32_32 : i32
    %60 = arith.andi %56, %59 : i1
    %61 = arith.extui %60 : i1 to i32
    %c0_i32_33 = arith.constant 0 : i32
    %62 = arith.cmpi ne, %61, %c0_i32_33 : i32
    scf.if %62 {
      %63 = tpu.iota {dimensions = array<i32: 1>} : vector<2x128xi32>
      %cst_34 = arith.constant dense<0xFF800000> : vector<2xf32>
      %64 = vector.multi_reduction <maximumf>, %53, %cst_34 [1] : vector<2x128xf32> to vector<2xf32>
      %65 = vector.shape_cast %64 : vector<2xf32> to vector<2x1xf32>
      %66 = vector.broadcast %65 : vector<2x1xf32> to vector<2x128xf32>
      %67 = arith.cmpf oeq, %53, %66 : vector<2x128xf32>
      %c128_i32 = arith.constant 128 : i32
      %68 = vector.broadcast %c128_i32 : i32 to vector<2x128xi32>
      %69 = arith.select %67, %63, %68 : vector<2x128xi1>, vector<2x128xi32>
      %cst_35 = arith.constant dense<2147483647> : vector<2xi32>
      %70 = vector.multi_reduction <minsi>, %69, %cst_35 [1] : vector<2x128xi32> to vector<2xi32>
      %71 = vector.shape_cast %70 : vector<2xi32> to vector<2x1xi32>
      %72 = vector.broadcast %71 : vector<2x1xi32> to vector<2x128xi32>
      %73 = arith.cmpi eq, %63, %72 : vector<2x128xi32>
      %74 = arith.extui %73 : vector<2x128xi1> to vector<2x128xi32>
      %75 = arith.sitofp %74 : vector<2x128xi32> to vector<2x128xf32>
      %c0_36 = arith.constant 0 : index
      %c0_37 = arith.constant 0 : index
      %76 = vector.load %arg5[%c0_36, %c0_37] : memref<128x32xf32, #tpu.memory_space<vmem>>, vector<128x32xf32>
      %cst_38 = arith.constant dense<0.000000e+00> : vector<2x32xf32>
      %77 = tpu.matmul %75, %76, %cst_38 {dimension_numbers = #tpu.dot_dimension_numbers<[1], [0], [0], [1], [0, 0, 1, 1], [], []>} : vector<2x128xf32>, vector<128x32xf32>, vector<2x32xf32> -> vector<2x32xf32>
      %c0_39 = arith.constant 0 : index
      %c0_40 = arith.constant 0 : index
      %78 = vector.load %arg13[%c0_39, %c0_40] : memref<2x32xf32, #tpu.memory_space<vmem>>, vector<2x32xf32>
      tpu.vector_store %arg13[%c0_39, %c0_40], %77 {strides = array<i32>} : memref<2x32xf32, #tpu.memory_space<vmem>>, vector<2x32xf32>,
    } else {
    }
    return
  }
  func.func @transform_0(%arg0: i32, %arg1: i32, %arg2: memref<7xi32, #tpu.memory_space<smem>>) -> (i32, i32) {
    %c0_i32 = arith.constant 0 : i32
    %c0_i32_0 = arith.constant 0 : i32
    return %arg0, %c0_i32 : i32, i32
  }
  func.func @transform_1(%arg0: i32, %arg1: i32, %arg2: memref<7xi32, #tpu.memory_space<smem>>) -> (i32, i32, i32) {
    %c0_i32 = arith.constant 0 : i32
    %c0_i32_0 = arith.constant 0 : i32
    return %arg1, %arg0, %c0_i32 : i32, i32, i32
  }
  func.func @transform_2(%arg0: i32, %arg1: i32, %arg2: memref<7xi32, #tpu.memory_space<smem>>) -> (i32, i32) {
    %c0_i32 = arith.constant 0 : i32
    %c0_i32_0 = arith.constant 0 : i32
    %c0_i32_1 = arith.constant 0 : i32
    return %c0_i32, %c0_i32_0 : i32, i32
  }
  func.func @transform_3(%arg0: i32, %arg1: i32, %arg2: memref<7xi32, #tpu.memory_space<smem>>) -> (i32, i32) {
    %c0_i32 = arith.constant 0 : i32
    %c0_i32_0 = arith.constant 0 : i32
    %c0_i32_1 = arith.constant 0 : i32
    return %c0_i32, %c0_i32_0 : i32, i32
  }
  func.func @transform_4(%arg0: i32, %arg1: i32, %arg2: memref<7xi32, #tpu.memory_space<smem>>) -> (i32, i32) {
    %c0_i32 = arith.constant 0 : i32
    %c0_i32_0 = arith.constant 0 : i32
    %c0_i32_1 = arith.constant 0 : i32
    return %c0_i32, %c0_i32_0 : i32, i32
  }
  func.func @transform_5(%arg0: i32, %arg1: i32, %arg2: memref<7xi32, #tpu.memory_space<smem>>) -> (i32, i32) {
    %c0_i32 = arith.constant 0 : i32
    %c0_i32_0 = arith.constant 0 : i32
    %c0_i32_1 = arith.constant 0 : i32
    return %c0_i32, %c0_i32_0 : i32, i32
  }
  func.func @transform_6(%arg0: i32, %arg1: i32, %arg2: memref<7xi32, #tpu.memory_space<smem>>) -> (i32, i32) {
    %c0_i32 = arith.constant 0 : i32
    %c0_i32_0 = arith.constant 0 : i32
    %c0_i32_1 = arith.constant 0 : i32
    return %c0_i32, %c0_i32_0 : i32, i32
  }
  func.func @transform_7(%arg0: i32, %arg1: i32, %arg2: memref<7xi32, #tpu.memory_space<smem>>) -> (i32, i32) {
    %c0_i32 = arith.constant 0 : i32
    %c0_i32_0 = arith.constant 0 : i32
    %c0_i32_1 = arith.constant 0 : i32
    return %c0_i32, %c0_i32_0 : i32, i32
  }
  func.func @transform_8(%arg0: i32, %arg1: i32, %arg2: memref<7xi32, #tpu.memory_space<smem>>) -> (i32, i32) {
    %c0_i32 = arith.constant 0 : i32
    %c0_i32_0 = arith.constant 0 : i32
    %c0_i32_1 = arith.constant 0 : i32
    return %c0_i32, %c0_i32_0 : i32, i32
  }
  func.func @transform_9(%arg0: i32, %arg1: i32, %arg2: memref<7xi32, #tpu.memory_space<smem>>) -> (i32, i32) {
    %c0_i32 = arith.constant 0 : i32
    return %arg0, %arg1 : i32, i32
  }
}

</mosaic_0001>

<bundles_post_ra>
// kernel: caption_decoder_forward.1
= control target key start
LH: loop header
LB: loop body
LE: loop exit
PB: predicated region body
PF: predicated region fallthrough
CT: control target
= control target key end

     0   :  { %s1511_s0 = inlined_call_operand.vmem [shape: s32[7], index: 0, kind: input, shape index: {}]   ;;  %s1512_s1 = inlined_call_operand.vmem [shape: f32[2,32], index: 1, kind: input, shape index: {}]   ;;  %s1513_s2 = inlined_call_operand.vmem [shape: f32[8,2,32], index: 2, kind: input, shape index: {}]   ;;  %s1514_s3 = inlined_call_operand.vmem [shape: f32[128,32], index: 3, kind: input, shape index: {}]   ;;  %s1515_s4 = inlined_call_operand.vmem [shape: f32[32,128], index: 4, kind: input, shape index: {}]   ;;  %s1516_s5 = inlined_call_operand.vmem [shape: f32[32,128], index: 5, kind: input, shape index: {}]   ;;  %s1517_s6 = inlined_call_operand.vmem [shape: f32[32,128], index: 6, kind: input, shape index: {}]   ;;  %s1518_s7 = inlined_call_operand.vmem [shape: f32[1,128], index: 7, kind: input, shape index: {}]   ;;  %s1519_s8 = inlined_call_operand.vmem [shape: f32[32,128], index: 8, kind: input, shape index: {}]   ;;  %s1520_s9 = inlined_call_operand.vmem [shape: f32[1,128], index: 9, kind: input, shape index: {}]   ;;  %s1521_s10 = inlined_call_operand.vmem [shape: f32[2,896], index: 10, kind: output, shape index: {}]  }
   0x1   :  { %s15_s15 = sshll.u32 %s1511_s0, 4  ;;  %s16_s15 = int_to_ptr.vmem [resolvable:$true] %s15_s15 }
   0x2   :  { %s1222_s16 = scalar_lea.vmem %s16_s15, 16  ;;  %p1227_p1 = scmp.lt.s32.totalorder %s16_s15, %s16_s15 }
   0x3   :  { %p1223_p0 = scmp.ne.s32.totalorder %s16_s15, %s1222_s16  ;;  %p1228_p2 = scmp.lt.s32.totalorder %s1222_s16, %s1222_s16 }
   0x5   :  { %p1229_p3 = por %p1228_p2, %p1227_p1 }
   0x7   :  { %p1230_p4 = pnand %p1229_p3, %p1223_p0 }
   0x9   :  { %1233 = shalt.err (!%p1230_p4)  }
   0xa   :  { %s1260_s17 = smov [#allocation7]  }
   0xb   :  { %18 = dma.vmem_to_smem %s16_s15, 16, %s1260_s17, [#allocation6] }
   0xc   :  { %1246 = dma.done.wait [#allocation6], 16 }
   0xd   :  { %1247 = vsyncadd [#allocation6], 4294967280 }
   0xe   :  { %20 = sfence }
   0xf   :  { %s1332_s18 = smov 0   ;;  %s1334_s19 = smov 0  }
  0x10   :  { %s1336_s20 = smov 0  }
  0x11 LB: > { %s35_s0 = sadd.s32 1, %s1254_s19  ;;  %p996_p5 = scmp.ge.s32.totalorder %s1258_s20, 1  ;;  %s1258_s20 = sphi %s1336_s20, %s26_s20   ;;  %s1254_s19 = sphi %s1334_s19, %s1523_s19   ;;  %s1250_s18 = sphi %s1332_s18, %s1522_s18  }
  0x12   : > { %p36_p6 = scmp.ge.s32.totalorder %s35_s0, 7  ;;  %p321_p7 = scmp.lt.s32.totalorder %s1258_s20, 8 }
  0x14   : > { %s1525_s0 = smov (%p36_p6, %s35_s0), 0  ;;  %p322_p8 = pnand %p996_p5, %p321_p7 }
  0x15   : > { %p370_p9 = scmp.lt.s32.totalorder (!%p322_p8), %s1250_s18, 7  ;;  %p379_p10 = scmp.lt.s32.totalorder (!%p322_p8), %s1250_s18, 6 }
  0x16   : > { %325 = sbr.rel (%p322_p8) target bundleno = 1860 (0x744), region = 56  ;;  %p385_p11 = scmp.eq.s32.totalorder (!%p322_p8), %s1250_s18, 0 }
  0x17   : > { %p999_p12 = scmp.ne.s32.totalorder (!%p322_p8), %s1250_s18, 0 }
  0x1d   : > { %s371_s21 = scalar_select %p370_p9, %s1250_s18, 7 }
  0x1e   : > { %s380_s22 = scalar_select %p379_p10, %s1250_s18, 6 }
  0x1f   : > { %s997_s23 = sshll.u32 %s371_s21, 1  ;;  %388 = sbr.rel (%p999_p12) target bundleno = 256 (0x100), region = 60  ;;  %v393_v0 = vld [vmem:[%s1516_s5] sm:$0xff] (!%p999_p12)  ;;  %v394_v1 = vld [vmem:[%s1516_s5 + $0x8] sm:$0xff] (!%p999_p12)  ;;  %v395_v2 = vld [vmem:[%s1516_s5 + $0x10] sm:$0xff] (!%p999_p12)  ;;  %vm390_vm0 = vcmask (!%p999_p12), 254976  }
  0x20   : > { %s1360_s26 = scalar_lea.vmem %s1513_s2, %s997_s23  ;;  %s998_s27 = sshll.u32 %s380_s22, 1  ;;  %v1261_v3 = vmov (!%p999_p12), 0.0|0.0   ;;  %v1129_v4 = vpack.c.bf16 (!%p999_p12), %v394_v1, %v393_v0  ;;  %v396_v5 = vld [vmem:[%s1516_s5 + $0x18] sm:$0xff] (!%p999_p12)  ;;  %v389_v6 = vld [vmem:[%s1512_s1] sm:$0x3] (!%p999_p12)  ;;  %v1262_v7 = vmov (!%p999_p12), 0.0  }
  0x21   : > { %s1365_s30 = scalar_lea.vmem %s1521_s10, %s998_s27  ;;  %1128 = vmatprep.subr.bf16.mxu0 (!%p999_p12), %v1261_v3  ;;  %392 = vst.msk [vmem:[#allocation4] sm:$0x3] (!%p999_p12), %vm390_vm0, %v1262_v7  ;;  %391 = vst.msk [vmem:[#allocation3] sm:$0x3] (!%p999_p12), %vm390_vm0, %v389_v6  ;;  %vm1263_vm1 = vmmov (!%p999_p12), 0   ;;  %v1132_v8 = vpack.c.bf16 (!%p999_p12), %v396_v5, %v395_v2  ;;  %vm404_vm2 = vcmask (!%p999_p12), 261120  }
  0x22   : > { %1057 = vmatprep.mubr.msk.f32.mxu0 (!%p999_p12), %vm1263_vm1, %v1262_v7  ;;  %1130 = vmatpush3.bf16.msra.mxu0 (!%p999_p12), %v1129_v4  ;;  %v1000_v9 = vld [vmem:[%s1518_s7] ss:$0 sm:$0xff] (!%p999_p12) }
  0x23   : > { %1131 = vmatprep.subr.bf16.mxu0 (!%p999_p12), %v1261_v3 }
  0x26   : > { %1133 = vmatpush3.bf16.msra.mxu0 %v1132_v8 }
  0x29   : > { %1058 = vmatmul.mubr.msk.f32.vlgmr.msra.gmra.mrb[0].mxu0 %vm404_vm2, %v389_v6 }
  0xfc   : > { %v474_v10 = vpop.f32.mrb[0].mxu0 }
  0xfd   : > { %v475_v11 = vadd.f32 %v1000_v9, %v474_v10  ;;  %v1059_v12 = vpop.f32.mrb[1].mxu0 }
  0xff   : > { %478 = vst [vmem:[#allocation5] sm:$0x3] %v475_v11 }
 0x100 PF: > { %s1002_s27 = sadd.s32 4294967295, %s1250_s18 }
 0x101   : > { %p480_p13 = scmp.gt.s32.totalorder %s1002_s27, 0 }
 0x103   : > { %s1527_s27 = smov (!%p480_p13, %s1002_s27), 0 }
 0x104   : > { %s482_s28 = sld [smem:[#allocation7 + %s1527_s27]] }
 0x10a   : > { %p483_p0 = scmp.eq.s32.totalorder %s482_s28, 1 }
 0x10c   : > { %p484_p1 = por %p483_p0, %p385_p11 }
 0x10d   : > { %v488_v13 = vld [vmem:[%s1360_s26] sm:$0x3] (%p484_p1)  ;;  %vm489_vm3 = vcmask (%p484_p1), 254976  }
 0x10e   : > { %487 = sbr.rel (!%p484_p1) target bundleno = 277 (0x115), region = 64  ;;  %490 = vst.msk [vmem:[#allocation2] sm:$0x3] (%p484_p1), %vm489_vm3, %v488_v13 }
 0x115 PF: > { %v498_v14 = vld [vmem:[%s1517_s6] sm:$0xff]  ;;  %v499_v15 = vld [vmem:[%s1517_s6 + $0x8] sm:$0xff]  ;;  %v1264_v17 = vmov 0.0|0.0   ;;  %v500_v20 = vld [vmem:[%s1517_s6 + $0x10] sm:$0xff]  ;;  %vm1265_vm4 = vmmov 0   ;;  %v1266_v25 = vmov 0.0  }
 0x116   : > { %v494_v16 = vld [vmem:[%s1515_s4] sm:$0xff]  ;;  %1134 = vmatprep.subr.bf16.mxu0 %v1264_v17  ;;  %1140 = vmatprep.subr.bf16.mxu1 %v1264_v17  ;;  %v1135_v18 = vpack.c.bf16 %v499_v15, %v498_v14  ;;  %v495_v19 = vld [vmem:[%s1515_s4 + $0x8] sm:$0xff]  ;;  %v501_v21 = vld [vmem:[%s1517_s6 + $0x18] sm:$0xff]  ;;  %vm502_vm5 = vcmask 261120   ;;  %s1267_s29 = smov 64   ;;  %s1268_s11 = smov 32  }
 0x117   : > { %v1141_v22 = vpack.c.bf16 %v495_v19, %v494_v16  ;;  %v496_v23 = vld [vmem:[%s1515_s4 + $0x10] sm:$0xff]  ;;  %v497_v24 = vld [vmem:[%s1515_s4 + $0x18] sm:$0xff]  ;;  %1068 = vmatprep.mubr.msk.f32.mxu0 %vm1265_vm4, %v1266_v25  ;;  %1079 = vmatprep.mubr.msk.f32.mxu1 %vm1265_vm4, %v1266_v25  ;;  %v1138_v26 = vpack.c.bf16 %v501_v21, %v500_v20  ;;  %v492_v28 = vld [vmem:[#allocation3] sm:$0x3]  ;;  %s1269_s22 = smov 96   ;;  %vm683_vm6 = vcmask 254976  }
 0x118   : > { %1136 = vmatpush3.bf16.msra.mxu0 %v1135_v18  ;;  %v1144_v27 = vpack.c.bf16 %v497_v24, %v496_v23  ;;  %v491_v29 = vld [vmem:[#allocation2] sm:$0x3]  ;;  %v649_v32 = vld [vmem:[#allocation5] sm:$0x3]  ;;  %v493_v38 = vld [vmem:[#allocation4] sm:$0x3] }
 0x119   : > { %1142 = vmatpush3.bf16.msra.mxu1 %v1141_v22  ;;  %1137 = vmatprep.subr.bf16.mxu0 %v1264_v17  ;;  %v690_v49 = vld [vmem:[%s1519_s8] sm:$0xff]  ;;  %v691_v50 = vld [vmem:[%s1519_s8 + $0x8] sm:$0xff]  ;;  %v692_v51 = vld [vmem:[%s1519_s8 + $0x10] sm:$0xff]  ;;  %s776_s23 = sld [smem:[#allocation7 + %s1250_s18]]  ;;  %s774_s24 = sadd.s32 1, %s1250_s18 }
 0x11a   : > { %1143 = vmatprep.subr.bf16.mxu1 %v1264_v17  ;;  %v1147_v52 = vpack.c.bf16 %v691_v50, %v690_v49  ;;  %v693_v53 = vld [vmem:[%s1519_s8 + $0x18] sm:$0xff]  ;;  %p775_p2 = scmp.lt.s32.totalorder %s774_s24, 7  ;;  %v1006_v60 = vld [vmem:[%s1520_s9] ss:$0 sm:$0xff] }
 0x11b   : > { %v1150_v54 = vpack.c.bf16 %v693_v53, %v692_v51 }
 0x11c   : > { %1139 = vmatpush3.bf16.msra.mxu0 %v1138_v26 }
 0x11d   : > { %1145 = vmatpush3.bf16.msra.mxu1 %v1144_v27  ;;  %1146 = vmatprep.subr.bf16.mxu0 %v1264_v17 }
 0x11f   : > { %1069 = vmatmul.mubr.msk.f32.vlgmr.msra.gmra.mrb[0].mxu0 %vm502_vm5, %v492_v28  ;;  %p777_p3 = scmp.eq.s32.totalorder %s776_s23, 0 }
 0x120   : > { %1080 = vmatmul.mubr.msk.f32.vlgmr.msra.gmra.mrb[0].mxu1 %vm502_vm5, %v491_v29  ;;  %1090 = vmatprep.mubr.msk.f32.mxu0 %vm1265_vm4, %v1266_v25 }
 0x121   : > { %1148 = vmatpush3.bf16.msra.mxu0 %v1147_v52  ;;  %p778_p4 = pnand %p777_p3, %p775_p2 }
 0x122   : > { %1149 = vmatprep.subr.bf16.mxu0 %v1264_v17  ;;  %vm784_vm7 = vcmask (!%p778_p4), 1041408   ;;  %v782_v1 = vlaneseq (!%p778_p4)  ;;  %v808_v8 = vld [vmem:[%s1514_s3] sm:$0xff] (!%p778_p4)  ;;  %v809_v9 = vld [vmem:[%s1514_s3 + $0x8] sm:$0xff] (!%p778_p4)  ;;  %v810_v10 = vld [vmem:[%s1514_s3 + $0x10] sm:$0xff] (!%p778_p4)  ;;  %v1270_v11 = vmov (!%p778_p4), 0.0|0.0   ;;  %vm1271_vm10 = vmmov (!%p778_p4), 0  }
 0x123   : > { %v1153_v12 = vpack.c.bf16 (!%p778_p4), %v809_v9, %v808_v8  ;;  %v811_v13 = vld [vmem:[%s1514_s3 + $0x18] sm:$0xff] (!%p778_p4)  ;;  %v812_v15 = vld [vmem:[%s1514_s3 + $0x20] sm:$0xff] (!%p778_p4)  ;;  %v813_v16 = vld [vmem:[%s1514_s3 + $0x28] sm:$0xff] (!%p778_p4) }
 0x124   : > { %v1449_v2 = vand.u32 (!%p778_p4), 127, %v782_v1  ;;  %v1156_v14 = vpack.c.bf16 (!%p778_p4), %v811_v13, %v810_v10  ;;  %v1159_v17 = vpack.c.bf16 (!%p778_p4), %v813_v16, %v812_v15  ;;  %v814_v18 = vld [vmem:[%s1514_s3 + $0x30] sm:$0xff] (!%p778_p4)  ;;  %v815_v19 = vld [vmem:[%s1514_s3 + $0x38] sm:$0xff] (!%p778_p4)  ;;  %v816_v21 = vld [vmem:[%s1514_s3 + $0x40] sm:$0xff] (!%p778_p4) }
 0x125   : > { %1151 = vmatpush3.bf16.msra.mxu0 %v1150_v54  ;;  %v1162_v20 = vpack.c.bf16 (!%p778_p4), %v815_v19, %v814_v18  ;;  %v817_v22 = vld [vmem:[%s1514_s3 + $0x48] sm:$0xff] (!%p778_p4)  ;;  %v818_v24 = vld [vmem:[%s1514_s3 + $0x50] sm:$0xff] (!%p778_p4)  ;;  %v819_v25 = vld [vmem:[%s1514_s3 + $0x58] sm:$0xff] (!%p778_p4) }
 0x126   : > { %1152 = vmatprep.subr.bf16.mxu0 (!%p778_p4), %v1270_v11  ;;  %v1165_v23 = vpack.c.bf16 (!%p778_p4), %v817_v22, %v816_v21  ;;  %v1168_v26 = vpack.c.bf16 (!%p778_p4), %v819_v25, %v818_v24  ;;  %v820_v27 = vld [vmem:[%s1514_s3 + $0x60] sm:$0xff] (!%p778_p4)  ;;  %v821_v28 = vld [vmem:[%s1514_s3 + $0x68] sm:$0xff] (!%p778_p4) }
 0x127   : > { %v1171_v29 = vpack.c.bf16 (!%p778_p4), %v821_v28, %v820_v27 }
 0x1f2   : > { %v572_v30 = vpop.f32.mrb[0].mxu0 }
 0x1f3   : > { %v645_v31 = vpop.f32.mrb[0].mxu1  ;;  %v1070_v33 = vpop.f32.mrb[1].mxu0 }
 0x1f4   : > { %v646_v34 = vadd.f32 %v645_v31, %v572_v30  ;;  %v1081_v35 = vpop.f32.mrb[1].mxu1 }
 0x1f5   : > { %v823_v35 = vld [vmem:[%s1514_s3 + $0x78] sm:$0xff] (!%p778_p4) }
 0x1f6   : > { %v650_v36 = vadd.f32 %v649_v32, %v646_v34  ;;  %v822_v34 = vld [vmem:[%s1514_s3 + $0x70] sm:$0xff] (!%p778_p4) }
 0x1f8   : > { %1214 = vtanh.f32 %v650_v36  ;;  %v1005_v39 = vmul.f32 -1.442695, %v650_v36  ;;  %v1174_v36 = vpack.c.bf16 (!%p778_p4), %v823_v35, %v822_v34 }
 0x1fa   : > { %1216 = vpow2.f32 %v1005_v39 }
 0x202   : > { %v1215_v37 = vpop.eup %1214 }
 0x203   : > { %664 = vrot.lane.b32.xlu0 %v1215_v37, %s1267_s29  ;;  %v1272_v37 = vmov (!%p778_p4), 0.0  }
 0x204   : > { %v1217_v40 = vpop.eup %1216 }
 0x205   : > { %v654_v41 = vadd.f32 1.0, %v1217_v40 }
 0x207   : > { %659 = vrot.lane.b32.xlu0 %v493_v38, %s1268_s11  ;;  %1218 = vrcp.f32 %v654_v41 }
 0x211   : > { %v1219_v42 = vpop.eup %1218 }
 0x275   : > { %v665_v43 = vpop.permute.xlu0 %664 }
 0x276   : > { %v667_v44 = vmul.f32 %v1219_v42, %v665_v43  ;;  %v1273_v43 = vmov (!%p778_p4), 1.0  }
 0x278   : > { %669 = vrot.lane.b32.xlu1 %v667_v44, %s1268_s11 }
 0x279   : > { %v660_v45 = vpop.permute.xlu0 %659 }
 0x27a   : > { %v662_v46 = vmul.f32 %v1219_v42, %v660_v45 }
 0x2ea   : > { %v670_v47 = vpop.permute.xlu1 %669 }
 0x2eb   : > { %v672_v48 = vadd.f32 %v670_v47, %v662_v46 }
 0x2ed   : > { %1220 = vtanh.f32 %v672_v48 }
 0x2f7   : > { %v1221_v55 = vpop.eup %1220 }
 0x2f8   : > { %675 = vrot.lane.b32.xlu1 %v1221_v55, %s1267_s29 }
 0x2fc   : > { %686 = vrot.lane.b32.xlu1 %v672_v48, %s1269_s22 }
 0x36a   : > { %v676_v56 = vpop.permute.xlu1 %675 }
 0x36b   : > { %v678_v57 = vmul.f32 %v1219_v42, %v676_v56 }
 0x36d   : > { %680 = vrot.lane.b32.xlu0 %v678_v57, %s1268_s11 }
 0x36e   : > { %v687_v58 = vpop.permute.xlu1 %686 }
 0x36f   : > { %689 = vst.msk [vmem:[#allocation4] sm:$0x3] %vm683_vm6, %v687_v58 }
 0x3df   : > { %v681_v59 = vpop.permute.xlu0 %680 }
 0x3e0   : > { %684 = vst.msk [vmem:[#allocation3] sm:$0x3] %vm683_vm6, %v681_v59  ;;  %1091 = vmatmul.mubr.msk.f32.vlgmr.msra.gmra.mrb[2].mxu0 %vm502_vm5, %v681_v59 }
 0x3e1   : > { %1154 = vmatpush3.bf16.msra.mxu0 (!%p778_p4), %v1153_v12  ;;  %1125 = vmatprep.mubr.msk.f32.mxu0 (!%p778_p4), %vm1271_vm10, %v1272_v37 }
 0x3e2   : > { %1155 = vmatprep.subr.bf16.mxu0 (!%p778_p4), %v1270_v11 }
 0x3e5   : > { %1157 = vmatpush3.bf16.msra.mxu0 (!%p778_p4), %v1156_v14 }
 0x3e6   : > { %1158 = vmatprep.subr.bf16.mxu0 (!%p778_p4), %v1270_v11 }
 0x3e9   : > { %1160 = vmatpush3.bf16.msra.mxu0 (!%p778_p4), %v1159_v17 }
 0x3ea   : > { %1161 = vmatprep.subr.bf16.mxu0 (!%p778_p4), %v1270_v11 }
 0x3ed   : > { %1163 = vmatpush3.bf16.msra.mxu0 (!%p778_p4), %v1162_v20 }
 0x3ee   : > { %1164 = vmatprep.subr.bf16.mxu0 (!%p778_p4), %v1270_v11 }
 0x3f1   : > { %1166 = vmatpush3.bf16.msra.mxu0 (!%p778_p4), %v1165_v23 }
 0x3f2   : > { %1167 = vmatprep.subr.bf16.mxu0 (!%p778_p4), %v1270_v11 }
 0x3f5   : > { %1169 = vmatpush3.bf16.msra.mxu0 (!%p778_p4), %v1168_v26 }
 0x3f6   : > { %1170 = vmatprep.subr.bf16.mxu0 (!%p778_p4), %v1270_v11 }
 0x3f9   : > { %1172 = vmatpush3.bf16.msra.mxu0 (!%p778_p4), %v1171_v29 }
 0x3fa   : > { %1173 = vmatprep.subr.bf16.mxu0 (!%p778_p4), %v1270_v11 }
 0x3fd   : > { %1175 = vmatpush3.bf16.msra.mxu0 (!%p778_p4), %v1174_v36 }
 0x4b0   : > { %781 = sbr.rel (%p778_p4) target bundleno = 1860 (0x744), region = 68 }
 0x4b3   : > { %v769_v61 = vpop.f32.mrb[2].mxu0 }
 0x4b4   : > { %v770_v62 = vadd.f32 %v1006_v60, %v769_v61  ;;  %v1092_v63 = vpop.f32.mrb[3].mxu0 }
 0x4b6   : > { %773 = vst [vmem:[%s1365_s30] sm:$0x3] %v770_v62  ;;  %v785_v0 = vsel (!%p778_p4), %vm784_vm7, %v770_v62, -inf }
 0x4b7   : > { %786 = vmax.xlane.f32.xlu0 %v785_v0 }
 0x544   : > { %v787_v3 = vpop.xlane.xlu0 %786 }
 0x545   : > { %vm788_vm8 = vcmp.eq.f32.partialorder %v770_v62, %v787_v3 }
 0x546   : > { %v789_v4 = vsel %vm788_vm8, %v1449_v2, 128 }
 0x547   : > { %v790_v5 = vsel %vm784_vm7, %v789_v4, 2147483647 }
 0x548   : > { %v792_v6 = vshra.s32 %v790_v5, 16  ;;  %v791_v30 = vand.u32 65535, %v790_v5 }
 0x54a   : > { %v794_v7 = vcvt.s32.f32 %v792_v6  ;;  %v793_v32 = vcvt.s32.f32 %v791_v30 }
 0x54c   : > { %795 = vmin.xlane.f32.xlu0 %v794_v7 }
 0x5d9   : > { %v796_v31 = vpop.xlane.xlu0 %795 }
 0x5da   : > { %vm797_vm9 = vcmp.eq.f32.partialorder %v794_v7, %v796_v31  ;;  %v802_v38 = vcvt.f32.s32 %v796_v31 }
 0x5db   : > { %v798_v33 = vsel %vm797_vm9, %v793_v32, inf }
 0x5dc   : > { %799 = vmin.xlane.f32.xlu1 %v798_v33  ;;  %v803_v40 = vshll.u32 %v802_v38, 16 }
 0x669   : > { %v800_v39 = vpop.xlane.xlu1 %799 }
 0x66a   : > { %v801_v41 = vcvt.f32.s32 %v800_v39 }
 0x66c   : > { %v804_v42 = vadd.s32 %v803_v40, %v801_v41 }
 0x66e   : > { %vm805_vm11 = vcmp.eq.s32.totalorder %v1449_v2, %v804_v42 }
 0x66f   : > { %1126 = vmatmul.mubr.msk.f32.vlgmr.msra.gmra.mrb[0].mxu0 %vm805_vm11, %v1273_v43 }
 0x742   : > { %v890_v44 = vpop.f32.mrb[0].mxu0 }
 0x743   : > { %894 = vst.msk [vmem:[#allocation2] sm:$0x3] %vm683_vm6, %v890_v44  ;;  %v1127_v45 = vpop.f32.mrb[1].mxu0 }
 0x744 PF: > { %s26_s20 = sadd.s32 1, %s1258_s20   ;;  %s1522_s18 = smov %s1254_s19 }
 0x745   : > { %p23_p5 = scmp.ge.s32.totalorder %s26_s20, 9   ;;  %s1523_s19 = smov %s1525_s0 }
 0x747   :  { %25 = sbr.rel (!%p23_p5) target bundleno = 17 (0x11), region = 101 }

</bundles_post_ra>
